<compile_context>
chip_gen: v6e
topology: v6e:2x2x1
jax: 0.10.0
libtpu: 0.0.40
codegen_flags: <defaults>
</compile_context>

<pallas_src>
import functools

import jax
import jax.numpy as jnp
from jax.experimental import pallas as pl
from jax.experimental.pallas import tpu as pltpu


def _round_up(x, m):
    return ((x + m - 1) // m) * m


def _ece_kernel(logits_ref, labels_ref, ece_ref,
                count_sc, conf_sc, acc_sc, *, n, c, n_bins, tn):
    pid = pl.program_id(0)

    @pl.when(pid == 0)
    def _():
        count_sc[...] = jnp.zeros_like(count_sc)
        conf_sc[...] = jnp.zeros_like(conf_sc)
        acc_sc[...] = jnp.zeros_like(acc_sc)

    # Load tile; cast to f32 in-kernel (HBM traffic stays in native dtype).
    logits = logits_ref[...].astype(jnp.float32)        # (TN, C)
    labels = labels_ref[...]                            # (TN, 1) int32

    # conf = max(softmax) = 1 / sum(exp(logits - rowmax)); exact divide.
    row_max = jnp.max(logits, axis=1, keepdims=True)    # (TN, 1)
    sum_e = jnp.sum(jnp.exp(logits - row_max), axis=1, keepdims=True)
    conf = 1.0 / sum_e                                  # (TN, 1)

    # pred = first-occurrence argmax of logits (matches torch.max / argmax).
    col = jax.lax.broadcasted_iota(jnp.int32, logits.shape, 1)
    pred = jnp.min(jnp.where(logits == row_max, col, c),
                   axis=1, keepdims=True)               # (TN, 1)
    acc = (pred == labels).astype(jnp.float32)          # (TN, 1)

    # Mask rows beyond N (remainder tile padding).
    row = jax.lax.broadcasted_iota(jnp.int32, (tn, 1), 0) + pid * tn
    valid_b = row < n                                   # (TN, 1) bool
    valid = valid_b.astype(jnp.float32)
    conf = jnp.where(valid_b, conf, 0.0)                # also kills NaN/Inf garbage

    # Bin bounds generated in-kernel: lowers = i/n_bins, uppers = (i+1)/n_bins.
    bidx = jax.lax.broadcasted_iota(jnp.int32, (1, n_bins), 1).astype(jnp.float32)
    lowers = bidx / jnp.float32(n_bins)
    uppers = (bidx + 1.0) / jnp.float32(n_bins)

    # Membership: conf > lower AND conf <= upper  -> (TN, n_bins)
    in_bin = jnp.logical_and(conf > lowers, conf <= uppers).astype(jnp.float32)
    in_bin = in_bin * valid

    count_sc[...] += jnp.sum(in_bin, axis=0, keepdims=True)         # (1, n_bins)
    conf_sc[...] += jnp.sum(in_bin * conf, axis=0, keepdims=True)   # (1, n_bins)
    acc_sc[...] += jnp.sum(in_bin * acc, axis=0, keepdims=True)     # (1, n_bins)

    @pl.when(pid == pl.num_programs(0) - 1)
    def _():
        count = count_sc[...]
        safe = jnp.where(count > 0.0, count, 1.0)
        gap = jnp.abs(conf_sc[...] / safe - acc_sc[...] / safe)
        prop = count / jnp.float32(n)
        contrib = jnp.where(count > 0.0, gap * prop, 0.0)
        ece_ref[...] = jnp.sum(contrib, axis=1, keepdims=True)      # (1, 1)


def _pick_tile_n(n, c, itemsize, tile_n):
    """Rows per tile: multiple of 8, <= round_up(N, 8)."""
    n_pad = _round_up(max(n, 1), 8)
    if tile_n is not None:
        return max(8, min(_round_up(tile_n, 8), n_pad))
    # Auto: ~1 MiB of logits per tile to amortize per-grid-step overhead,
    # capped at 2048 rows so lane-padded (TN, *) intermediates stay small.
    target_bytes = 1 << 20
    row_bytes = max(c * itemsize, 1)
    tn = (target_bytes // row_bytes) // 8 * 8
    tn = max(512, min(tn, 2048))
    return min(tn, n_pad)


def ece_loss(logits, labels, n_bins=20, tile_n=None):
    """Pallas implementation of _ECELoss.forward. Returns shape (1,) f32."""
    N, C = logits.shape
    tn = _pick_tile_n(N, C, jnp.dtype(logits.dtype).itemsize, tile_n)
    grid = (pl.cdiv(N, tn),)
    labels2d = labels.reshape(N, 1).astype(jnp.int32)

    out = pl.pallas_call(
        functools.partial(_ece_kernel, n=N, c=C, n_bins=n_bins, tn=tn),
        out_shape=jax.ShapeDtypeStruct((1, 1), jnp.float32),
        grid_spec=pltpu.PrefetchScalarGridSpec(
            num_scalar_prefetch=0,
            grid=grid,
            in_specs=[
                pl.BlockSpec((tn, C), lambda i: (i, 0)),   # logits tile
                pl.BlockSpec((tn, 1), lambda i: (i, 0)),   # labels tile
            ],
            out_specs=pl.BlockSpec((1, 1), lambda i: (0, 0)),
            scratch_shapes=[
                pltpu.VMEM((1, n_bins), jnp.float32),      # count per bin
                pltpu.VMEM((1, n_bins), jnp.float32),      # sum(conf) per bin
                pltpu.VMEM((1, n_bins), jnp.float32),      # sum(acc) per bin
            ],
        ),
        compiler_params=pltpu.CompilerParams(
            dimension_semantics=("arbitrary",),            # reduction over N tiles
            vmem_limit_bytes=32 * 1024 * 1024,             # safe on v5e/v6e/v7x
        ),
    )(logits, labels2d)
    return out.reshape(1)


def _ece_ref(logits, labels, n_bins=20):
    """Pure-JAX reference mirroring the PyTorch semantics."""
    sm = jax.nn.softmax(logits.astype(jnp.float32), axis=1)
    conf = jnp.max(sm, axis=1)
    pred = jnp.argmax(sm, axis=1)
    acc = (pred == labels).astype(jnp.float32)
    bounds = jnp.arange(n_bins + 1, dtype=jnp.float32) / jnp.float32(n_bins)
    ece = jnp.zeros((1,), jnp.float32)
    for i in range(n_bins):
        lo, hi = bounds[i], bounds[i + 1]
        in_bin = jnp.logical_and(conf > lo, conf <= hi).astype(jnp.float32)
        cnt = jnp.sum(in_bin)
        prop = cnt / conf.shape[0]
        safe = jnp.where(cnt > 0, cnt, 1.0)
        acc_b = jnp.sum(in_bin * acc) / safe
        conf_b = jnp.sum(in_bin * conf) / safe
        ece = ece + jnp.where(cnt > 0, jnp.abs(conf_b - acc_b) * prop, 0.0)
    return ece


if __name__ == "__main__":
    key = jax.random.PRNGKey(0)
    k_logits, k_labels = jax.random.split(key)
    # Small but multi-tile shapes: N=200 with 64-row tiles -> grid of 4 with a
    # ragged last tile (exercises tiling + row masking).
    N, C = 200, 16
    logits = jax.random.normal(k_logits, (N, C), dtype=jnp.float32) * 3.0
    labels = jax.random.randint(k_labels, (N,), 0, C, dtype=jnp.int32)

    out = ece_loss(logits, labels, n_bins=20, tile_n=64)
    out = jax.block_until_ready(out)
    ref = jax.block_until_ready(_ece_ref(logits, labels, n_bins=20))
    assert out.shape == (1,)
    assert jnp.allclose(out, ref, atol=1e-5), (out, ref)

    # Also exercise the auto-tiling path (single shot, default tile choice).
    out_auto = jax.block_until_ready(ece_loss(logits, labels, n_bins=20))
    assert jnp.allclose(out_auto, ref, atol=1e-5), (out_auto, ref)

    print("KERNEL_OK")
</pallas_src>

<mosaic_0001>
module attributes {stable_mosaic.version = 11 : i64} {
  func.func @_ece_kernel(%arg0: i32, %arg1: memref<64x16xf32, #tpu.memory_space<vmem>>, %arg2: memref<64x1xi32, #tpu.memory_space<vmem>>, %arg3: memref<1x1xf32, #tpu.memory_space<vmem>>, %arg4: memref<1x20xf32, #tpu.memory_space<vmem>>, %arg5: memref<1x20xf32, #tpu.memory_space<vmem>>, %arg6: memref<1x20xf32, #tpu.memory_space<vmem>>) attributes {dimension_semantics = [#tpu.dimension_semantics<arbitrary>], iteration_bounds = array<i64: 4>, scalar_prefetch = 0 : i64, scratch_operands = 3 : i64, tpu.core_type = #tpu.core_type<tc>, window_params = [{transform_indices = @transform_0, window_bounds = array<i64: 64, 16>}, {transform_indices = @transform_1, window_bounds = array<i64: 64, 1>}, {pipeline_mode = #tpu.pipeline_mode<synchronous>, transform_indices = @transform_2, window_bounds = array<i64: 1, 1>}]} {
    %c0_i32 = arith.constant 0 : i32
    %0 = arith.cmpi eq, %arg0, %c0_i32 : i32
    %1 = arith.extui %0 : i1 to i32
    %c0_i32_0 = arith.constant 0 : i32
    %2 = arith.cmpi ne, %1, %c0_i32_0 : i32
    scf.if %2 {
      %cst_27 = arith.constant 0.000000e+00 : f32
      %75 = vector.broadcast %cst_27 : f32 to vector<1x20xf32>
      %c0_28 = arith.constant 0 : index
      %c0_29 = arith.constant 0 : index
      %76 = vector.load %arg4[%c0_28, %c0_29] : memref<1x20xf32, #tpu.memory_space<vmem>>, vector<1x20xf32>
      tpu.vector_store %arg4[%c0_28, %c0_29], %75 {strides = array<i32>} : memref<1x20xf32, #tpu.memory_space<vmem>>, vector<1x20xf32>,
      %cst_30 = arith.constant 0.000000e+00 : f32
      %77 = vector.broadcast %cst_30 : f32 to vector<1x20xf32>
      %c0_31 = arith.constant 0 : index
      %c0_32 = arith.constant 0 : index
      %78 = vector.load %arg5[%c0_31, %c0_32] : memref<1x20xf32, #tpu.memory_space<vmem>>, vector<1x20xf32>
      tpu.vector_store %arg5[%c0_31, %c0_32], %77 {strides = array<i32>} : memref<1x20xf32, #tpu.memory_space<vmem>>, vector<1x20xf32>,
      %cst_33 = arith.constant 0.000000e+00 : f32
      %79 = vector.broadcast %cst_33 : f32 to vector<1x20xf32>
      %c0_34 = arith.constant 0 : index
      %c0_35 = arith.constant 0 : index
      %80 = vector.load %arg6[%c0_34, %c0_35] : memref<1x20xf32, #tpu.memory_space<vmem>>, vector<1x20xf32>
      tpu.vector_store %arg6[%c0_34, %c0_35], %79 {strides = array<i32>} : memref<1x20xf32, #tpu.memory_space<vmem>>, vector<1x20xf32>,
    } else {
    }
    %c0 = arith.constant 0 : index
    %c0_1 = arith.constant 0 : index
    %3 = vector.load %arg1[%c0, %c0_1] : memref<64x16xf32, #tpu.memory_space<vmem>>, vector<64x16xf32>
    %c0_2 = arith.constant 0 : index
    %c0_3 = arith.constant 0 : index
    %4 = vector.load %arg2[%c0_2, %c0_3] : memref<64x1xi32, #tpu.memory_space<vmem>>, vector<64x1xi32>
    %cst = arith.constant dense<0xFF800000> : vector<64xf32>
    %5 = vector.multi_reduction <maximumf>, %3, %cst [1] : vector<64x16xf32> to vector<64xf32>
    %6 = vector.shape_cast %5 : vector<64xf32> to vector<64x1xf32>
    %7 = vector.broadcast %6 : vector<64x1xf32> to vector<64x16xf32>
    %8 = arith.subf %3, %7 : vector<64x16xf32>
    %9 = math.exp %8 : vector<64x16xf32>
    %cst_4 = arith.constant dense<0.000000e+00> : vector<64xf32>
    %10 = vector.multi_reduction <add>, %9, %cst_4 [1] : vector<64x16xf32> to vector<64xf32>
    %11 = vector.shape_cast %10 : vector<64xf32> to vector<64x1xf32>
    %cst_5 = arith.constant 1.000000e+00 : f32
    %12 = vector.broadcast %cst_5 : f32 to vector<64x1xf32>
    %13 = arith.divf %12, %11 : vector<64x1xf32>
    %14 = tpu.iota {dimensions = array<i32: 1>} : vector<64x16xi32>
    %15 = vector.broadcast %6 : vector<64x1xf32> to vector<64x16xf32>
    %16 = arith.cmpf oeq, %3, %15 : vector<64x16xf32>
    %c16_i32 = arith.constant 16 : i32
    %17 = vector.broadcast %c16_i32 : i32 to vector<64x16xi32>
    %18 = arith.select %16, %14, %17 : vector<64x16xi1>, vector<64x16xi32>
    %cst_6 = arith.constant dense<2147483647> : vector<64xi32>
    %19 = vector.multi_reduction <minsi>, %18, %cst_6 [1] : vector<64x16xi32> to vector<64xi32>
    %20 = vector.shape_cast %19 : vector<64xi32> to vector<64x1xi32>
    %21 = arith.cmpi eq, %20, %4 : vector<64x1xi32>
    %22 = arith.extui %21 : vector<64x1xi1> to vector<64x1xi32>
    %23 = arith.sitofp %22 : vector<64x1xi32> to vector<64x1xf32>
    %24 = tpu.iota {dimensions = array<i32: 0>} : vector<64x1xi32>
    %c64_i32 = arith.constant 64 : i32
    %25 = arith.muli %arg0, %c64_i32 : i32
    %26 = vector.broadcast %25 : i32 to vector<64x1xi32>
    %27 = arith.addi %24, %26 : vector<64x1xi32>
    %c200_i32 = arith.constant 200 : i32
    %28 = vector.broadcast %c200_i32 : i32 to vector<64x1xi32>
    %29 = arith.cmpi slt, %27, %28 : vector<64x1xi32>
    %30 = arith.extui %29 : vector<64x1xi1> to vector<64x1xi32>
    %31 = arith.sitofp %30 : vector<64x1xi32> to vector<64x1xf32>
    %cst_7 = arith.constant 0.000000e+00 : f32
    %32 = vector.broadcast %cst_7 : f32 to vector<64x1xf32>
    %33 = arith.select %29, %13, %32 : vector<64x1xi1>, vector<64x1xf32>
    %34 = tpu.iota {dimensions = array<i32: 1>} : vector<1x20xi32>
    %35 = arith.sitofp %34 : vector<1x20xi32> to vector<1x20xf32>
    %cst_8 = arith.constant 2.000000e+01 : f32
    %36 = vector.broadcast %cst_8 : f32 to vector<1x20xf32>
    %37 = arith.divf %35, %36 : vector<1x20xf32>
    %cst_9 = arith.constant 1.000000e+00 : f32
    %38 = vector.broadcast %cst_9 : f32 to vector<1x20xf32>
    %39 = arith.addf %35, %38 : vector<1x20xf32>
    %cst_10 = arith.constant 2.000000e+01 : f32
    %40 = vector.broadcast %cst_10 : f32 to vector<1x20xf32>
    %41 = arith.divf %39, %40 : vector<1x20xf32>
    %42 = vector.broadcast %33 : vector<64x1xf32> to vector<64x20xf32>
    %43 = vector.broadcast %37 : vector<1x20xf32> to vector<64x20xf32>
    %44 = arith.cmpf ogt, %42, %43 : vector<64x20xf32>
    %45 = vector.broadcast %33 : vector<64x1xf32> to vector<64x20xf32>
    %46 = vector.broadcast %41 : vector<1x20xf32> to vector<64x20xf32>
    %47 = arith.cmpf ole, %45, %46 : vector<64x20xf32>
    %48 = arith.andi %44, %47 : vector<64x20xi1>
    %49 = arith.extui %48 : vector<64x20xi1> to vector<64x20xi32>
    %50 = arith.sitofp %49 : vector<64x20xi32> to vector<64x20xf32>
    %51 = vector.broadcast %31 : vector<64x1xf32> to vector<64x20xf32>
    %52 = arith.mulf %50, %51 : vector<64x20xf32>
    %c0_11 = arith.constant 0 : index
    %c0_12 = arith.constant 0 : index
    %53 = vector.load %arg4[%c0_11, %c0_12] : memref<1x20xf32, #tpu.memory_space<vmem>>, vector<1x20xf32>
    %cst_13 = arith.constant dense<0.000000e+00> : vector<20xf32>
    %54 = vector.multi_reduction <add>, %52, %cst_13 [0] : vector<64x20xf32> to vector<20xf32>
    %55 = vector.shape_cast %54 : vector<20xf32> to vector<1x20xf32>
    %56 = arith.addf %53, %55 : vector<1x20xf32>
    %c0_14 = arith.constant 0 : index
    %c0_15 = arith.constant 0 : index
    %57 = vector.load %arg4[%c0_14, %c0_15] : memref<1x20xf32, #tpu.memory_space<vmem>>, vector<1x20xf32>
    tpu.vector_store %arg4[%c0_14, %c0_15], %56 {strides = array<i32>} : memref<1x20xf32, #tpu.memory_space<vmem>>, vector<1x20xf32>,
    %c0_16 = arith.constant 0 : index
    %c0_17 = arith.constant 0 : index
    %58 = vector.load %arg5[%c0_16, %c0_17] : memref<1x20xf32, #tpu.memory_space<vmem>>, vector<1x20xf32>
    %59 = vector.broadcast %33 : vector<64x1xf32> to vector<64x20xf32>
    %60 = arith.mulf %52, %59 : vector<64x20xf32>
    %cst_18 = arith.constant dense<0.000000e+00> : vector<20xf32>
    %61 = vector.multi_reduction <add>, %60, %cst_18 [0] : vector<64x20xf32> to vector<20xf32>
    %62 = vector.shape_cast %61 : vector<20xf32> to vector<1x20xf32>
    %63 = arith.addf %58, %62 : vector<1x20xf32>
    %c0_19 = arith.constant 0 : index
    %c0_20 = arith.constant 0 : index
    %64 = vector.load %arg5[%c0_19, %c0_20] : memref<1x20xf32, #tpu.memory_space<vmem>>, vector<1x20xf32>
    tpu.vector_store %arg5[%c0_19, %c0_20], %63 {strides = array<i32>} : memref<1x20xf32, #tpu.memory_space<vmem>>, vector<1x20xf32>,
    %c0_21 = arith.constant 0 : index
    %c0_22 = arith.constant 0 : index
    %65 = vector.load %arg6[%c0_21, %c0_22] : memref<1x20xf32, #tpu.memory_space<vmem>>, vector<1x20xf32>
    %66 = vector.broadcast %23 : vector<64x1xf32> to vector<64x20xf32>
    %67 = arith.mulf %52, %66 : vector<64x20xf32>
    %cst_23 = arith.constant dense<0.000000e+00> : vector<20xf32>
    %68 = vector.multi_reduction <add>, %67, %cst_23 [0] : vector<64x20xf32> to vector<20xf32>
    %69 = vector.shape_cast %68 : vector<20xf32> to vector<1x20xf32>
    %70 = arith.addf %65, %69 : vector<1x20xf32>
    %c0_24 = arith.constant 0 : index
    %c0_25 = arith.constant 0 : index
    %71 = vector.load %arg6[%c0_24, %c0_25] : memref<1x20xf32, #tpu.memory_space<vmem>>, vector<1x20xf32>
    tpu.vector_store %arg6[%c0_24, %c0_25], %70 {strides = array<i32>} : memref<1x20xf32, #tpu.memory_space<vmem>>, vector<1x20xf32>,
    %c3_i32 = arith.constant 3 : i32
    %72 = arith.cmpi eq, %arg0, %c3_i32 : i32
    %73 = arith.extui %72 : i1 to i32
    %c0_i32_26 = arith.constant 0 : i32
    %74 = arith.cmpi ne, %73, %c0_i32_26 : i32
    scf.if %74 {
      %c0_27 = arith.constant 0 : index
      %c0_28 = arith.constant 0 : index
      %75 = vector.load %arg4[%c0_27, %c0_28] : memref<1x20xf32, #tpu.memory_space<vmem>>, vector<1x20xf32>
      %cst_29 = arith.constant 0.000000e+00 : f32
      %76 = vector.broadcast %cst_29 : f32 to vector<1x20xf32>
      %77 = arith.cmpf ogt, %75, %76 : vector<1x20xf32>
      %cst_30 = arith.constant 1.000000e+00 : f32
      %78 = vector.broadcast %cst_30 : f32 to vector<1x20xf32>
      %79 = arith.select %77, %75, %78 : vector<1x20xi1>, vector<1x20xf32>
      %c0_31 = arith.constant 0 : index
      %c0_32 = arith.constant 0 : index
      %80 = vector.load %arg5[%c0_31, %c0_32] : memref<1x20xf32, #tpu.memory_space<vmem>>, vector<1x20xf32>
      %81 = arith.divf %80, %79 : vector<1x20xf32>
      %c0_33 = arith.constant 0 : index
      %c0_34 = arith.constant 0 : index
      %82 = vector.load %arg6[%c0_33, %c0_34] : memref<1x20xf32, #tpu.memory_space<vmem>>, vector<1x20xf32>
      %83 = arith.divf %82, %79 : vector<1x20xf32>
      %84 = arith.subf %81, %83 : vector<1x20xf32>
      %85 = math.absf %84 : vector<1x20xf32>
      %cst_35 = arith.constant 2.000000e+02 : f32
      %86 = vector.broadcast %cst_35 : f32 to vector<1x20xf32>
      %87 = arith.divf %75, %86 : vector<1x20xf32>
      %cst_36 = arith.constant 0.000000e+00 : f32
      %88 = vector.broadcast %cst_36 : f32 to vector<1x20xf32>
      %89 = arith.cmpf ogt, %75, %88 : vector<1x20xf32>
      %90 = arith.mulf %85, %87 : vector<1x20xf32>
      %cst_37 = arith.constant 0.000000e+00 : f32
      %91 = vector.broadcast %cst_37 : f32 to vector<1x20xf32>
      %92 = arith.select %89, %90, %91 : vector<1x20xi1>, vector<1x20xf32>
      %cst_38 = arith.constant dense<0.000000e+00> : vector<1xf32>
      %93 = vector.multi_reduction <add>, %92, %cst_38 [1] : vector<1x20xf32> to vector<1xf32>
      %94 = vector.shape_cast %93 : vector<1xf32> to vector<1x1xf32>
      %c0_39 = arith.constant 0 : index
      %c0_40 = arith.constant 0 : index
      %95 = vector.load %arg3[%c0_39, %c0_40] : memref<1x1xf32, #tpu.memory_space<vmem>>, vector<1x1xf32>
      tpu.vector_store %arg3[%c0_39, %c0_40], %94 {strides = array<i32>} : memref<1x1xf32, #tpu.memory_space<vmem>>, vector<1x1xf32>,
    } else {
    }
    return
  }
  func.func @transform_0(%arg0: i32) -> (i32, i32) {
    %c0_i32 = arith.constant 0 : i32
    %c0_i32_0 = arith.constant 0 : i32
    return %arg0, %c0_i32 : i32, i32
  }
  func.func @transform_1(%arg0: i32) -> (i32, i32) {
    %c0_i32 = arith.constant 0 : i32
    %c0_i32_0 = arith.constant 0 : i32
    return %arg0, %c0_i32 : i32, i32
  }
  func.func @transform_2(%arg0: i32) -> (i32, i32) {
    %c0_i32 = arith.constant 0 : i32
    %c0_i32_0 = arith.constant 0 : i32
    %c0_i32_1 = arith.constant 0 : i32
    return %c0_i32, %c0_i32_0 : i32, i32
  }
}

</mosaic_0001>

<bundles_post_ra>
// kernel: tpu_custom_call.1
= control target key start
LH: loop header
LB: loop body
LE: loop exit
PB: predicated region body
PF: predicated region fallthrough
CT: control target
= control target key end

     0   :  { %7 = vsyncpa [#allocation6], 0  ;;  %s937_s9 = smov 0   ;;  %s1283_s0 = inlined_call_operand.vmem [shape: f32[200,16], index: 0, kind: input, shape index: {}]   ;;  %s1284_s1 = inlined_call_operand.vmem [shape: s32[200,1], index: 1, kind: input, shape index: {}]   ;;  %s1285_s2 = inlined_call_operand.hbm [shape: f32[1,1], index: 2, kind: output, shape index: {}]  }
   0x1 LB: > { %s943_s10 = sadd.s32 4294967295, %s916_s9   ;;  %p787_p0 = scmp.ge.s32.totalorder %s916_s9, 1  ;;  %s916_s9 = sphi %s937_s9, %s13_s9  }
   0x2   : > { %p136_p1 = scmp.lt.s32.totalorder %s916_s9, 5 }
   0x4   : > { %p137_p2 = pnand %p787_p0, %p136_p1 }
   0x5   : > { %s788_s11 = sshll.u32 (!%p137_p2), %s943_s10, 3  ;;  %p792_p4 = scmp.ne.s32.totalorder (!%p137_p2), %s943_s10, 0 }
   0x6   : > { %140 = sbr.rel (%p137_p2) target bundleno = 799 (0x31f), region = 28  ;;  %p171_p3 = scmp.lt.s32.totalorder (!%p137_p2), %s788_s11, 24 }
   0xb   : > { %s1287_s11 = smov (!%p171_p3, %s788_s11), 24  ;;  %197 = sbr.rel (%p792_p4) target bundleno = 19 (0x13), region = 32 }
   0xc   : > { %s789_s12 = sshll.u32 %s1287_s11, 3 }
   0xd   : > { %s174_s15 = scalar_lea.vmem %s1283_s0, %s789_s12  ;;  %s954_s18 = scalar_lea.vmem %s1284_s1, %s789_s12 }
  0x10   : > { %vm198_vm0 = vcmask 155648   ;;  %v918_v0 = vmov 0.0  }
  0x11   : > { %199 = vst.msk [vmem:[#allocation2] sm:$0x1] %vm198_vm0, %v918_v0  ;;  %200 = vst.msk [vmem:[#allocation3] sm:$0x1] %vm198_vm0, %v918_v0 }
  0x12   : > { %201 = vst.msk [vmem:[#allocation4] sm:$0x1] %vm198_vm0, %v918_v0 }
  0x13 PF: > { %v957_v1 = vld [vmem:[%s174_s15] sm:$0xff]  ;;  %vm218_vm1 = vcmask 130048   ;;  %v959_v2 = vld [vmem:[%s174_s15 + $0x10] sm:$0xff]  ;;  %v961_v3 = vld [vmem:[%s174_s15 + $0x8] sm:$0xff]  ;;  %v307_v17 = vlaneseq  ;;  %s801_s19 = sshll.u32 %s943_s10, 6  ;;  %p818_p5 = scmp.ne.s32.totalorder %s943_s10, 3 }
  0x14   : > { %v219_v4 = vsel %vm218_vm1, %v957_v1, -inf  ;;  %v225_v5 = vsel %vm218_vm1, %v959_v2, -inf  ;;  %v967_v6 = vld [vmem:[%s174_s15 + $0x18] sm:$0xff]  ;;  %v222_v7 = vsel %vm218_vm1, %v961_v3, -inf  ;;  %v973_v9 = vld [vmem:[%s174_s15 + $0x20] sm:$0xff]  ;;  %v975_v10 = vld [vmem:[%s174_s15 + $0x28] sm:$0xff] }
  0x15   : > { %220 = vmax.xlane.f32.xlu0 %v219_v4  ;;  %226 = vmax.xlane.f32.xlu1 %v225_v5  ;;  %v228_v8 = vsel %vm218_vm1, %v967_v6, -inf  ;;  %v231_v11 = vsel %vm218_vm1, %v973_v9, -inf  ;;  %v234_v12 = vsel %vm218_vm1, %v975_v10, -inf  ;;  %v981_v13 = vld [vmem:[%s174_s15 + $0x30] sm:$0xff]  ;;  %v983_v14 = vld [vmem:[%s174_s15 + $0x38] sm:$0xff]  ;;  %v990_v18 = vand.u32 127, %v307_v17 }
  0x16   : > { %v237_v15 = vsel %vm218_vm1, %v981_v13, -inf  ;;  %v240_v16 = vsel %vm218_vm1, %v983_v14, -inf }
  0x19   : > { %223 = vmax.xlane.f32.xlu0 %v222_v7  ;;  %229 = vmax.xlane.f32.xlu1 %v228_v8 }
  0x1d   : > { %232 = vmax.xlane.f32.xlu0 %v231_v11  ;;  %235 = vmax.xlane.f32.xlu1 %v234_v12 }
  0x21   : > { %238 = vmax.xlane.f32.xlu0 %v237_v15  ;;  %241 = vmax.xlane.f32.xlu1 %v240_v16 }
  0x9e   : > { %v221_v19 = vpop.xlane.xlu0 %220  ;;  %v992_v20 = vpop.xlane.xlu1 %226 }
  0x9f   : > { %vm309_vm2 = vcmp.eq.f32.partialorder %v957_v1, %v221_v19  ;;  %vm311_vm3 = vcmp.eq.f32.partialorder %v959_v2, %v992_v20  ;;  %v243_v60 = vsub.f32 %v957_v1, %v221_v19  ;;  %v245_v61 = vsub.f32 %v959_v2, %v992_v20 }
  0xa0   : > { %v317_v21 = vsel %vm309_vm2, %v990_v18, 16  ;;  %v319_v22 = vsel %vm311_vm3, %v990_v18, 16 }
  0xa1   : > { %v325_v23 = vsel %vm218_vm1, %v317_v21, 2147483647  ;;  %v355_v27 = vsel %vm218_vm1, %v319_v22, 2147483647  ;;  %v251_v4 = vmul.f32 1.442695, %v243_v60 }
  0xa2   : > { %v1000_v24 = vpop.xlane.xlu0 %223  ;;  %v1002_v25 = vpop.xlane.xlu1 %229  ;;  %v327_v26 = vshra.s32 %v325_v23, 16  ;;  %v357_v31 = vshra.s32 %v355_v27, 16  ;;  %v326_v59 = vand.u32 65535, %v325_v23  ;;  %v356_v0 = vand.u32 65535, %v355_v27 }
  0xa3   : > { %vm310_vm4 = vcmp.eq.f32.partialorder %v961_v3, %v1000_v24  ;;  %vm312_vm5 = vcmp.eq.f32.partialorder %v967_v6, %v1002_v25  ;;  %v244_v5 = vsub.f32 %v961_v3, %v1000_v24  ;;  %v246_v7 = vsub.f32 %v967_v6, %v1002_v25 }
  0xa4   : > { %v318_v28 = vsel %vm310_vm4, %v990_v18, 16  ;;  %v329_v29 = vcvt.s32.f32 %v327_v26  ;;  %v320_v30 = vsel %vm312_vm5, %v990_v18, 16  ;;  %v359_v37 = vcvt.s32.f32 %v357_v31 }
  0xa5   : > { %v340_v34 = vsel %vm218_vm1, %v318_v28, 2147483647  ;;  %v1019_v35 = vsel %vm218_vm1, %v320_v30, 2147483647  ;;  %v328_v63 = vcvt.s32.f32 %v326_v59  ;;  %v255_v1 = vmul.f32 1.442695, %v245_v61 }
  0xa6   : > { %330 = vmin.xlane.f32.xlu0 %v329_v29  ;;  %v1011_v32 = vpop.xlane.xlu0 %232  ;;  %v1013_v33 = vpop.xlane.xlu1 %235  ;;  %v342_v39 = vshra.s32 %v340_v34, 16  ;;  %v372_v42 = vshra.s32 %v1019_v35, 16  ;;  %v341_v11 = vand.u32 65535, %v340_v34  ;;  %v358_v15 = vcvt.s32.f32 %v356_v0 }
  0xa7   : > { %vm313_vm6 = vcmp.eq.f32.partialorder %v973_v9, %v1011_v32  ;;  %vm314_vm7 = vcmp.eq.f32.partialorder %v975_v10, %v1013_v33  ;;  %v247_v2 = vsub.f32 %v973_v9, %v1011_v32  ;;  %848 = vpow2.f32 %v251_v4 }
  0xa8   : > { %v321_v36 = vsel %vm313_vm6, %v990_v18, 16  ;;  %v322_v38 = vsel %vm314_vm7, %v990_v18, 16  ;;  %v344_v44 = vcvt.s32.f32 %v342_v39  ;;  %v1042_v48 = vcvt.s32.f32 %v372_v42 }
  0xa9   : > { %v1031_v43 = vsel %vm218_vm1, %v321_v36, 2147483647  ;;  %v1036_v45 = vsel %vm218_vm1, %v322_v38, 2147483647  ;;  %v253_v16 = vmul.f32 1.442695, %v244_v5  ;;  %v343_v21 = vcvt.s32.f32 %v341_v11 }
  0xaa   : > { %360 = vmin.xlane.f32.xlu0 %v359_v37  ;;  %v1025_v40 = vpop.xlane.xlu0 %238  ;;  %v1027_v41 = vpop.xlane.xlu1 %241  ;;  %345 = vmin.xlane.f32.xlu1 %v344_v44  ;;  %v387_v49 = vshra.s32 %v1031_v43, 16  ;;  %v402_v50 = vshra.s32 %v1036_v45, 16  ;;  %v257_v3 = vmul.f32 1.442695, %v246_v7  ;;  %v371_v6 = vand.u32 65535, %v1019_v35 }
  0xab   : > { %vm315_vm8 = vcmp.eq.f32.partialorder %v981_v13, %v1025_v40  ;;  %vm316_vm9 = vcmp.eq.f32.partialorder %v983_v14, %v1027_v41  ;;  %v386_v22 = vand.u32 65535, %v1031_v43  ;;  %850 = vpow2.f32 %v255_v1 }
  0xac   : > { %v323_v46 = vsel %vm315_vm8, %v990_v18, 16  ;;  %v324_v47 = vsel %vm316_vm9, %v990_v18, 16  ;;  %v389_v52 = vcvt.s32.f32 %v387_v49  ;;  %v1054_v55 = vcvt.s32.f32 %v402_v50 }
  0xad   : > { %v1047_v51 = vsel %vm218_vm1, %v323_v46, 2147483647  ;;  %v1051_v54 = vsel %vm218_vm1, %v324_v47, 2147483647  ;;  %v259_v23 = vmul.f32 1.442695, %v247_v2  ;;  %v248_v9 = vsub.f32 %v975_v10, %v1013_v33 }
  0xae   : > { %v417_v53 = vshra.s32 %v1047_v51, 16  ;;  %375 = vmin.xlane.f32.xlu1 %v1042_v48  ;;  %390 = vmin.xlane.f32.xlu0 %v389_v52  ;;  %v432_v57 = vshra.s32 %v1051_v54, 16  ;;  %852 = vpow2.f32 %v253_v16  ;;  %v249_v24 = vsub.f32 %v981_v13, %v1025_v40  ;;  %v212_v16 = vld [vmem:[%s954_s18 + $0x10] sm:$0xff] }
  0xaf   : > { %854 = vpow2.f32 %v257_v3  ;;  %v373_v28 = vcvt.s32.f32 %v371_v6  ;;  %v401_v30 = vand.u32 65535, %v1036_v45  ;;  %v416_v31 = vand.u32 65535, %v1047_v51 }
  0xb0   : > { %v1056_v56 = vcvt.s32.f32 %v417_v53  ;;  %v1061_v58 = vcvt.s32.f32 %v432_v57  ;;  %856 = vpow2.f32 %v259_v23  ;;  %v261_v10 = vmul.f32 1.442695, %v248_v9 }
  0xb1   : > { %v263_v13 = vmul.f32 1.442695, %v249_v24  ;;  %v250_v32 = vsub.f32 %v983_v14, %v1027_v41  ;;  %v418_v38 = vcvt.s32.f32 %v416_v31  ;;  %v431_v39 = vand.u32 65535, %v1051_v54 }
  0xb2   : > { %405 = vmin.xlane.f32.xlu1 %v1054_v55  ;;  %420 = vmin.xlane.f32.xlu0 %v1056_v56  ;;  %858 = vpow2.f32 %v261_v10  ;;  %v919_v53 = vmov 0  }
  0xb3   : > { %860 = vpow2.f32 %v263_v13  ;;  %v265_v14 = vmul.f32 1.442695, %v250_v32  ;;  %847 = vset.pattern.permute.xlu1 %v919_v53  ;;  %841 = vset.pattern.permute.xlu0 %v919_v53  ;;  %v213_v32 = vld [vmem:[%s954_s18 + $0x18] sm:$0xff] }
  0xb4   : > { %v849_v42 = vpop.eup %848 }
  0xb5   : > { %862 = vpow2.f32 %v265_v14  ;;  %v267_v47 = vsel %vm218_vm1, %v849_v42, 0.0  ;;  %v214_v14 = vld [vmem:[%s954_s18 + $0x20] sm:$0xff] }
  0xb6   : > { %435 = vmin.xlane.f32.xlu1 %v1061_v58 }
  0xb8   : > { %v851_v45 = vpop.eup %850 }
 0x12f   : > { %v1067_v62 = vpop.xlane.xlu0 %330 }
 0x130   : > { %vm332_vm10 = vcmp.eq.f32.partialorder %v329_v29, %v1067_v62  ;;  %v388_v29 = vcvt.s32.f32 %v386_v22 }
 0x131   : > { %v333_v8 = vsel %vm332_vm10, %v328_v63, inf  ;;  %v337_v63 = vcvt.f32.s32 %v1067_v62 }
 0x132   : > { %334 = vmin.xlane.f32.xlu0 %v333_v8 }
 0x133   : > { %v1076_v12 = vpop.xlane.xlu0 %360  ;;  %v1079_v20 = vpop.xlane.xlu1 %345  ;;  %v338_v7 = vshll.u32 %v337_v63, 16 }
 0x134   : > { %vm362_vm11 = vcmp.eq.f32.partialorder %v359_v37, %v1076_v12  ;;  %vm347_vm12 = vcmp.eq.f32.partialorder %v344_v44, %v1079_v20  ;;  %v403_v37 = vcvt.s32.f32 %v401_v30  ;;  %v433_v44 = vcvt.s32.f32 %v431_v39 }
 0x135   : > { %v363_v19 = vsel %vm362_vm11, %v358_v15, inf  ;;  %v348_v25 = vsel %vm347_vm12, %v343_v21, inf  ;;  %v367_v4 = vcvt.f32.s32 %v1076_v12  ;;  %v352_v8 = vcvt.f32.s32 %v1079_v20  ;;  %v210_v21 = vld [vmem:[%s954_s18] sm:$0xff]  ;;  %v211_v12 = vld [vmem:[%s954_s18 + $0x8] sm:$0xff] }
 0x136   : > { %364 = vmin.xlane.f32.xlu0 %v363_v19  ;;  %349 = vmin.xlane.f32.xlu1 %v348_v25  ;;  %v920_v20 = vmov 0.0   ;;  %vm574_vm11 = vcmask 162816  }
 0x137   : > { %v1088_v26 = vpop.xlane.xlu1 %375  ;;  %v1090_v27 = vpop.xlane.xlu0 %390  ;;  %v368_v1 = vshll.u32 %v367_v4, 16  ;;  %v353_v22 = vshll.u32 %v352_v8, 16 }
 0x138   : > { %vm377_vm13 = vcmp.eq.f32.partialorder %v1042_v48, %v1088_v26  ;;  %vm392_vm14 = vcmp.eq.f32.partialorder %v389_v52, %v1090_v27  ;;  %v853_v48 = vpop.eup %852  ;;  %v273_v52 = vsel %vm218_vm1, %v851_v45, 0.0  ;;  %v382_v3 = vcvt.f32.s32 %v1088_v26 }
 0x139   : > { %v378_v33 = vsel %vm377_vm13, %v373_v28, inf  ;;  %v393_v34 = vsel %vm392_vm14, %v388_v29, inf  ;;  %v855_v49 = vpop.eup %854  ;;  %v270_v51 = vsel %vm218_vm1, %v853_v48, 0.0  ;;  %v397_v19 = vcvt.f32.s32 %v1090_v27  ;;  %v215_v48 = vld [vmem:[%s954_s18 + $0x28] sm:$0xff] }
 0x13a   : > { %379 = vmin.xlane.f32.xlu1 %v378_v33  ;;  %394 = vmin.xlane.f32.xlu0 %v393_v34  ;;  %v857_v50 = vpop.eup %856  ;;  %v383_v25 = vshll.u32 %v382_v3, 16 }
 0x13b   : > { %v1099_v35 = vpop.xlane.xlu1 %405  ;;  %v1101_v36 = vpop.xlane.xlu0 %420  ;;  %v398_v28 = vshll.u32 %v397_v19, 16 }
 0x13c   : > { %vm407_vm15 = vcmp.eq.f32.partialorder %v1054_v55, %v1099_v35  ;;  %vm422_vm0 = vcmp.eq.f32.partialorder %v1056_v56, %v1101_v36  ;;  %v859_v54 = vpop.eup %858  ;;  %v276_v55 = vsel %vm218_vm1, %v855_v49, 0.0  ;;  %v279_v56 = vsel %vm218_vm1, %v857_v50, 0.0 }
 0x13d   : > { %v408_v40 = vsel %vm407_vm15, %v403_v37, inf  ;;  %v423_v41 = vsel %vm422_vm0, %v418_v38, inf  ;;  %v861_v57 = vpop.eup %860  ;;  %v412_v27 = vcvt.f32.s32 %v1099_v35 }
 0x13e   : > { %409 = vmin.xlane.f32.xlu1 %v408_v40  ;;  %424 = vmin.xlane.f32.xlu0 %v423_v41  ;;  %v285_v59 = vsel %vm218_vm1, %v861_v57, 0.0  ;;  %v863_v60 = vpop.eup %862  ;;  %v427_v41 = vcvt.f32.s32 %v1101_v36  ;;  %v520_v57 = vcvt.s32.f32 %v990_v18 }
 0x13f   : > { %v1108_v43 = vpop.xlane.xlu1 %435  ;;  %v288_v61 = vsel %vm218_vm1, %v863_v60, 0.0  ;;  %v413_v40 = vshll.u32 %v412_v27, 16 }
 0x140   : > { %vm437_vm2 = vcmp.eq.f32.partialorder %v1061_v58, %v1108_v43  ;;  %v282_v58 = vsel %vm218_vm1, %v859_v54, 0.0  ;;  %v428_v49 = vshll.u32 %v427_v41, 16  ;;  %v442_v50 = vcvt.f32.s32 %v1108_v43 }
 0x141   : > { %v438_v46 = vsel %vm437_vm2, %v433_v44, inf  ;;  %v1146_v19 = vmul.f32 0.05, %v520_v57 }
 0x142   : > { %439 = vmin.xlane.f32.xlu1 %v438_v46  ;;  %268 = vadd.xlane.f32.xlu0 %v267_v47 }
 0x146   : > { %271 = vadd.xlane.f32.xlu1 %v270_v51  ;;  %274 = vadd.xlane.f32.xlu0 %v273_v52 }
 0x14a   : > { %277 = vadd.xlane.f32.xlu1 %v276_v55  ;;  %280 = vadd.xlane.f32.xlu0 %v279_v56  ;;  %v216_v55 = vld [vmem:[%s954_s18 + $0x30] sm:$0xff]  ;;  %v470_v56 = vshrl.u32 %v307_v17, 7 }
 0x14c   : > { %v472_v60 = vadd.s32 16, %v470_v56  ;;  %v471_v63 = vadd.s32 8, %v470_v56  ;;  %v473_v17 = vadd.s32 24, %v470_v56 }
 0x14e   : > { %283 = vadd.xlane.f32.xlu1 %v282_v58  ;;  %286 = vadd.xlane.f32.xlu0 %v285_v59  ;;  %v443_v58 = vshll.u32 %v442_v50, 16  ;;  %v479_v59 = vstv %s801_s19 }
 0x14f   : > { %v480_v8 = vadd.s32 %v479_v59, %v470_v56 }
 0x151   : > { %vm488_vm10 = vcmp.lt.s32.totalorder %v480_v8, 200 }
 0x152   : > { %289 = vadd.xlane.f32.xlu1 %v288_v61 }
 0x1bb   : > { %v335_v0 = vpop.xlane.xlu0 %334 }
 0x1bc   : > { %v336_v5 = vcvt.f32.s32 %v335_v0 }
 0x1be   : > { %v339_v15 = vadd.s32 %v338_v7, %v336_v5  ;;  %v217_v5 = vld [vmem:[%s954_s18 + $0x38] sm:$0xff]  ;;  %v523_v7 = vadd.f32 1.0, %v520_v57 }
 0x1bf   : > { %v365_v11 = vpop.xlane.xlu0 %364  ;;  %v350_v6 = vpop.xlane.xlu1 %349 }
 0x1c0   : > { %v366_v2 = vcvt.f32.s32 %v365_v11  ;;  %v351_v23 = vcvt.f32.s32 %v350_v6  ;;  %vm445_vm3 = vcmp.eq.s32.totalorder %v339_v15, %v210_v21  ;;  %v482_v11 = vadd.s32 %v479_v59, %v472_v60 }
 0x1c1   : > { %v793_v10 = vsel %vm445_vm3, 1.0, %v920_v20  ;;  %v475_v15 = vadd.s32 40, %v470_v56  ;;  %v1148_v21 = vmul.f32 0.05, %v523_v7  ;;  %v476_v6 = vadd.s32 48, %v470_v56 }
 0x1c2   : > { %v369_v62 = vadd.s32 %v368_v1, %v366_v2  ;;  %v354_v9 = vadd.s32 %v353_v22, %v351_v23  ;;  %v474_v1 = vadd.s32 32, %v470_v56  ;;  %v481_v2 = vadd.s32 %v479_v59, %v471_v63 }
 0x1c3   : > { %v380_v29 = vpop.xlane.xlu1 %379  ;;  %v395_v26 = vpop.xlane.xlu0 %394  ;;  %vm490_vm12 = vcmp.lt.s32.totalorder %v482_v11, 200 }
 0x1c4   : > { %vm447_vm1 = vcmp.eq.s32.totalorder %v369_v62, %v212_v16  ;;  %vm446_vm4 = vcmp.eq.s32.totalorder %v354_v9, %v211_v12  ;;  %v381_v30 = vcvt.f32.s32 %v380_v29  ;;  %v396_v31 = vcvt.f32.s32 %v395_v26 }
 0x1c5   : > { %v795_v24 = vsel %vm447_vm1, 1.0, %v920_v20  ;;  %v794_v13 = vsel %vm446_vm4, 1.0, %v920_v20  ;;  %v483_v62 = vadd.s32 %v479_v59, %v473_v17  ;;  %v484_v12 = vadd.s32 %v479_v59, %v474_v1 }
 0x1c6   : > { %644 = vperm.xlu1 %847, %v795_v24   ;;  %v384_v33 = vadd.s32 %v383_v25, %v381_v30  ;;  %v399_v34 = vadd.s32 %v398_v28, %v396_v31  ;;  %v842_v37 = vpack.i.bf16 %v794_v13, %v793_v10  ;;  %v477_v9 = vadd.s32 56, %v470_v56 }
 0x1c7   : > { %v410_v38 = vpop.xlane.xlu1 %409  ;;  %v425_v39 = vpop.xlane.xlu0 %424  ;;  %vm489_vm13 = vcmp.lt.s32.totalorder %v481_v2, 200  ;;  %v485_v25 = vadd.s32 %v479_v59, %v475_v15  ;;  %v802_v29 = vsel %vm488_vm10, 1.0, %v920_v20  ;;  %v1156_v26 = vadd.s32 %v479_v59, %v476_v6 }
 0x1c8   : > { %v411_v35 = vcvt.f32.s32 %v410_v38  ;;  %843 = vperm.xlu0 %841, %v842_v37   ;;  %vm448_vm5 = vcmp.eq.s32.totalorder %v384_v33, %v213_v32  ;;  %v426_v45 = vcvt.f32.s32 %v425_v39  ;;  %vm449_vm6 = vcmp.eq.s32.totalorder %v399_v34, %v214_v14 }
 0x1c9   : > { %v796_v42 = vsel %vm448_vm5, 1.0, %v920_v20  ;;  %v797_v36 = vsel %vm449_vm6, 1.0, %v920_v20  ;;  %v804_v27 = vsel %vm490_vm12, 1.0, %v920_v20  ;;  %v803_v30 = vsel %vm489_vm13, 1.0, %v920_v20 }
 0x1ca   : > { %v414_v44 = vadd.s32 %v413_v40, %v411_v35  ;;  %649 = vperm.xlu1 %847, %v796_v42   ;;  %v429_v51 = vadd.s32 %v428_v49, %v426_v45  ;;  %vm491_vm2 = vcmp.lt.s32.totalorder %v483_v62, 200  ;;  %vm492_vm1 = vcmp.lt.s32.totalorder %v484_v12, 200 }
 0x1cb   : > { %v440_v46 = vpop.xlane.xlu1 %439  ;;  %v269_v47 = vpop.xlane.xlu0 %268  ;;  %v805_v13 = vsel %vm491_vm2, 1.0, %v920_v20  ;;  %v1165_v32 = vadd.s32 %v479_v59, %v477_v9  ;;  %v806_v38 = vsel %vm492_vm1, 1.0, %v920_v20  ;;  %vm493_vm3 = vcmp.lt.s32.totalorder %v485_v25, 200 }
 0x1cc   : > { %864 = vrcp.f32 %v269_v47  ;;  %v441_v52 = vcvt.f32.s32 %v440_v46  ;;  %vm450_vm7 = vcmp.eq.s32.totalorder %v414_v44, %v215_v48  ;;  %vm451_vm8 = vcmp.eq.s32.totalorder %v429_v51, %v216_v55 }
 0x1cd   : > { %v798_v43 = vsel %vm450_vm7, 1.0, %v920_v20  ;;  %v799_v18 = vsel %vm451_vm8, 1.0, %v920_v20  ;;  %vm494_vm6 = vcmp.lt.s32.totalorder %v1156_v26, 200  ;;  %v807_v40 = vsel %vm493_vm3, 1.0, %v920_v20 }
 0x1ce   : > { %654 = vperm.xlu1 %847, %v797_v36   ;;  %v444_v61 = vadd.s32 %v443_v58, %v441_v52  ;;  %v808_v44 = vsel %vm494_vm6, 1.0, %v920_v20 }
 0x1cf   : > { %v272_v53 = vpop.xlane.xlu1 %271  ;;  %v275_v54 = vpop.xlane.xlu0 %274 }
 0x1d0   : > { %866 = vrcp.f32 %v272_v53  ;;  %vm452_vm9 = vcmp.eq.s32.totalorder %v444_v61, %v217_v5 }
 0x1d1   : > { %868 = vrcp.f32 %v275_v54  ;;  %v800_v23 = vsel %vm452_vm9, 1.0, %v920_v20 }
 0x1d2   : > { %659 = vperm.xlu1 %847, %v798_v43  }
 0x1d3   : > { %v278_v0 = vpop.xlane.xlu1 %277  ;;  %v281_v4 = vpop.xlane.xlu0 %280 }
 0x1d4   : > { %870 = vrcp.f32 %v278_v0 }
 0x1d5   : > { %872 = vrcp.f32 %v281_v4 }
 0x1d6   : > { %664 = vperm.xlu1 %847, %v799_v18  }
 0x1d7   : > { %v284_v16 = vpop.xlane.xlu1 %283  ;;  %v287_v3 = vpop.xlane.xlu0 %286 }
 0x1d8   : > { %874 = vrcp.f32 %v284_v16 }
 0x1d9   : > { %v865_v22 = vpop.eup %864  ;;  %876 = vrcp.f32 %v287_v3 }
 0x1da   : > { %669 = vperm.xlu1 %847, %v800_v23   ;;  %v512_v24 = vsel %vm488_vm10, %v865_v22, 0.0 }
 0x1db   : > { %v290_v28 = vpop.xlane.xlu1 %289  ;;  %vm525_vm14 = vcmp.gt.f32.partialorder %v512_v24, %v1146_v19  ;;  %vm533_vm15 = vcmp.le.f32.partialorder %v512_v24, %v1148_v21 }
 0x1dc   : > { %878 = vrcp.f32 %v290_v28  ;;  %vm541_vm0 = vmand %vm525_vm14, %vm533_vm15 }
 0x1dd   : > { %v867_v31 = vpop.eup %866  ;;  %v810_v10 = vsel %vm541_vm0, 1.0, %v920_v20 }
 0x1de   : > { %v869_v33 = vpop.eup %868  ;;  %v513_v34 = vsel %vm489_vm13, %v867_v31, 0.0  ;;  %v1168_v37 = vmul.f32 %v810_v10, %v802_v29 }
 0x1df   : > { %v514_v39 = vsel %vm490_vm12, %v869_v33, 0.0  ;;  %vm526_vm4 = vcmp.gt.f32.partialorder %v513_v34, %v1146_v19  ;;  %vm534_vm5 = vcmp.le.f32.partialorder %v513_v34, %v1148_v21  ;;  %vm495_vm12 = vcmp.lt.s32.totalorder %v1165_v32, 200 }
 0x1e0   : > { %vm527_vm7 = vcmp.gt.f32.partialorder %v514_v39, %v1146_v19  ;;  %vm535_vm8 = vcmp.le.f32.partialorder %v514_v39, %v1148_v21  ;;  %vm542_vm9 = vmand %vm526_vm4, %vm534_vm5  ;;  %v600_v14 = vmul.f32 %v1168_v37, %v512_v24  ;;  %v575_v42 = vsel %vm574_vm11, %v1168_v37, 0.0 }
 0x1e1   : > { %v871_v41 = vpop.eup %870  ;;  %vm543_vm10 = vmand %vm527_vm7, %vm535_vm8  ;;  %v811_v35 = vsel %vm542_vm9, 1.0, %v920_v20  ;;  %v809_v28 = vsel %vm495_vm12, 1.0, %v920_v20 }
 0x1e2   : > { %v873_v45 = vpop.eup %872  ;;  %v812_v46 = vsel %vm543_vm10, 1.0, %v920_v20  ;;  %v1189_v47 = vmul.f32 %v811_v35, %v803_v30  ;;  %v608_v48 = vsel %vm574_vm11, %v600_v14, 0.0  ;;  %v515_v49 = vsel %vm491_vm2, %v871_v41, 0.0 }
 0x1e3   : > { %v1193_v50 = vmul.f32 %v812_v46, %v804_v27  ;;  %vm528_vm13 = vcmp.gt.f32.partialorder %v515_v49, %v1146_v19  ;;  %vm536_vm14 = vcmp.le.f32.partialorder %v515_v49, %v1148_v21  ;;  %v516_v36 = vsel %vm492_vm1, %v873_v45, 0.0 }
 0x1e4   : > { %v576_v51 = vsel %vm574_vm11, %v1189_v47, 0.0  ;;  %v601_v52 = vmul.f32 %v1189_v47, %v513_v34  ;;  %vm544_vm15 = vmand %vm528_vm13, %vm536_vm14  ;;  %vm529_vm0 = vcmp.gt.f32.partialorder %v516_v36, %v1146_v19  ;;  %vm537_vm4 = vcmp.le.f32.partialorder %v516_v36, %v1148_v21 }
 0x1e5   : > { %v875_v53 = vpop.eup %874  ;;  %v578_v54 = vsel %vm574_vm11, %v1193_v50, 0.0  ;;  %v602_v55 = vmul.f32 %v1193_v50, %v514_v39  ;;  %v577_v56 = vadd.f32 %v576_v51, %v575_v42  ;;  %v813_v57 = vsel %vm544_vm15, 1.0, %v920_v20  ;;  %vm545_vm2 = vmand %vm529_vm0, %vm537_vm4  ;;  %v573_v51 = vld [vmem:[#allocation2] sm:$0x1] }
 0x1e6   : > { %v609_v58 = vsel %vm574_vm11, %v601_v52, 0.0  ;;  %v1208_v59 = vmul.f32 %v813_v57, %v805_v13  ;;  %v814_v43 = vsel %vm545_vm2, 1.0, %v920_v20  ;;  %v517_v60 = vsel %vm493_vm3, %v875_v53, 0.0  ;;  %v877_v61 = vpop.eup %876 }
 0x1e7   : > { %v611_v63 = vsel %vm574_vm11, %v602_v55, 0.0  ;;  %v610_v0 = vadd.f32 %v609_v58, %v608_v48  ;;  %v579_v4 = vadd.f32 %v578_v54, %v577_v56  ;;  %v1213_v5 = vmul.f32 %v814_v43, %v806_v38  ;;  %v599_v54 = vld [vmem:[#allocation3] sm:$0x1] }
 0x1e8   : > { %v580_v7 = vsel %vm574_vm11, %v1208_v59, 0.0  ;;  %v603_v8 = vmul.f32 %v1208_v59, %v515_v49  ;;  %vm530_vm1 = vcmp.gt.f32.partialorder %v517_v60, %v1146_v19  ;;  %vm538_vm5 = vcmp.le.f32.partialorder %v517_v60, %v1148_v21 }
 0x1e9   : > { %v879_v17 = vpop.eup %878  ;;  %v581_v18 = vadd.f32 %v580_v7, %v579_v4  ;;  %v612_v11 = vadd.f32 %v611_v63, %v610_v0  ;;  %v582_v1 = vsel %vm574_vm11, %v1213_v5, 0.0  ;;  %v604_v2 = vmul.f32 %v1213_v5, %v516_v36  ;;  %vm546_vm3 = vmand %vm530_vm1, %vm538_vm5 }
 0x1ea   : > { %v613_v15 = vsel %vm574_vm11, %v603_v8, 0.0  ;;  %v815_v16 = vsel %vm546_vm3, 1.0, %v920_v20  ;;  %v518_v3 = vsel %vm494_vm6, %v877_v61, 0.0  ;;  %v519_v6 = vsel %vm495_vm12, %v879_v17, 0.0 }
 0x1eb   : > { %v614_v62 = vadd.f32 %v613_v15, %v612_v11  ;;  %v583_v22 = vadd.f32 %v582_v1, %v581_v18  ;;  %v615_v23 = vsel %vm574_vm11, %v604_v2, 0.0  ;;  %v1230_v12 = vmul.f32 %v815_v16, %v807_v40 }
 0x1ec   : > { %vm531_vm7 = vcmp.gt.f32.partialorder %v518_v3, %v1146_v19  ;;  %vm539_vm8 = vcmp.le.f32.partialorder %v518_v3, %v1148_v21  ;;  %vm532_vm9 = vcmp.gt.f32.partialorder %v519_v6, %v1146_v19  ;;  %vm540_vm10 = vcmp.le.f32.partialorder %v519_v6, %v1148_v21 }
 0x1ed   : > { %v616_v9 = vadd.f32 %v615_v23, %v614_v62  ;;  %v584_v24 = vsel %vm574_vm11, %v1230_v12, 0.0  ;;  %v605_v25 = vmul.f32 %v1230_v12, %v517_v60  ;;  %vm547_vm6 = vmand %vm531_vm7, %vm539_vm8  ;;  %vm597_vm12 = vcmask 155648  }
 0x1ee   : > { %v585_v29 = vadd.f32 %v584_v24, %v583_v22  ;;  %v816_v26 = vsel %vm547_vm6, 1.0, %v920_v20  ;;  %vm548_vm13 = vmand %vm532_vm9, %vm540_vm10 }
 0x1ef   : > { %v617_v27 = vsel %vm574_vm11, %v605_v25, 0.0  ;;  %v571_v19 = vmul.f32 %v816_v26, %v808_v44  ;;  %v817_v21 = vsel %vm548_vm13, 1.0, %v920_v20 }
 0x1f0   : > { %v618_v30 = vadd.f32 %v617_v27, %v616_v9  ;;  %v572_v31 = vmul.f32 %v817_v21, %v809_v28 }
 0x1f1   : > { %v586_v10 = vsel %vm574_vm11, %v571_v19, 0.0  ;;  %v606_v13 = vmul.f32 %v571_v19, %v518_v3 }
 0x1f2   : > { %v587_v33 = vadd.f32 %v586_v10, %v585_v29  ;;  %v588_v34 = vsel %vm574_vm11, %v572_v31, 0.0  ;;  %v607_v38 = vmul.f32 %v572_v31, %v519_v6 }
 0x1f3   : > { %v619_v32 = vsel %vm574_vm11, %v606_v13, 0.0  ;;  %v631_v13 = vld [vmem:[#allocation4] sm:$0x1] }
 0x1f4   : > { %v620_v39 = vadd.f32 %v619_v32, %v618_v30  ;;  %v621_v14 = vsel %vm574_vm11, %v607_v38, 0.0  ;;  %v589_v40 = vadd.f32 %v588_v34, %v587_v33 }
 0x1f6   : > { %v590_v41 = vrot.slane %v589_v40, 4  ;;  %v622_v35 = vadd.f32 %v621_v14, %v620_v39 }
 0x1f8   : > { %v591_v42 = vadd.f32 %v590_v41, %v589_v40  ;;  %v623_v44 = vrot.slane %v622_v35, 4 }
 0x1fa   : > { %v592_v20 = vrot.slane %v591_v42, 2  ;;  %v624_v45 = vadd.f32 %v623_v44, %v622_v35 }
 0x1fc   : > { %v593_v46 = vadd.f32 %v592_v20, %v591_v42  ;;  %v625_v48 = vrot.slane %v624_v45, 2 }
 0x1fe   : > { %v594_v49 = vrot.slane %v593_v46, 1  ;;  %v626_v36 = vadd.f32 %v625_v48, %v624_v45 }
 0x200   : > { %v595_v52 = vadd.f32 %v594_v49, %v593_v46  ;;  %v627_v53 = vrot.slane %v626_v36, 1 }
 0x202   : > { %v596_v55 = vadd.f32 %v595_v52, %v573_v51  ;;  %v628_v56 = vadd.f32 %v627_v53, %v626_v36 }
 0x204   : > { %598 = vst.msk [vmem:[#allocation2] sm:$0x1] %vm597_vm12, %v596_v55  ;;  %v629_v57 = vadd.f32 %v628_v56, %v599_v54 }
 0x206   : > { %630 = vst.msk [vmem:[#allocation3] sm:$0x1] %vm597_vm12, %v629_v57 }
 0x241   : > { %v645_v58 = vpop.permute.xlu1 %644 }
 0x242   : > { %v674_v0 = vmul.f32 %v645_v58, %v1193_v50 }
 0x243   : > { %v844_v43 = vpop.permute.xlu0 %843 }
 0x244   : > { %v846_v60 = vunpack.i.h.bf16 %v844_v43  ;;  %v845_v61 = vunpack.i.l.bf16 %v844_v43  ;;  %v683_v2 = vsel %vm574_vm11, %v674_v0, 0.0 }
 0x245   : > { %v650_v63 = vpop.permute.xlu1 %649 }
 0x246   : > { %v673_v4 = vmul.f32 %v846_v60, %v1189_v47  ;;  %v672_v7 = vmul.f32 %v845_v61, %v1168_v37  ;;  %v675_v18 = vmul.f32 %v650_v63, %v1208_v59 }
 0x248   : > { %v681_v8 = vsel %vm574_vm11, %v673_v4, 0.0  ;;  %v680_v17 = vsel %vm574_vm11, %v672_v7, 0.0  ;;  %v685_v16 = vsel %vm574_vm11, %v675_v18, 0.0 }
 0x249   : > { %v682_v11 = vadd.f32 %v681_v8, %v680_v17  ;;  %v655_v1 = vpop.permute.xlu1 %654 }
 0x24a   : > { %v676_v3 = vmul.f32 %v655_v1, %v1213_v5 }
 0x24b   : > { %v684_v15 = vadd.f32 %v683_v2, %v682_v11 }
 0x24c   : > { %v687_v37 = vsel %vm574_vm11, %v676_v3, 0.0 }
 0x24d   : > { %v686_v50 = vadd.f32 %v685_v16, %v684_v15  ;;  %v660_v6 = vpop.permute.xlu1 %659 }
 0x24e   : > { %v677_v47 = vmul.f32 %v660_v6, %v1230_v12 }
 0x24f   : > { %v688_v62 = vadd.f32 %v687_v37, %v686_v50 }
 0x250   : > { %v689_v23 = vsel %vm574_vm11, %v677_v47, 0.0 }
 0x251   : > { %v665_v22 = vpop.permute.xlu1 %664  ;;  %v690_v24 = vadd.f32 %v689_v23, %v688_v62 }
 0x252   : > { %v678_v59 = vmul.f32 %v665_v22, %v571_v19 }
 0x254   : > { %v691_v9 = vsel %vm574_vm11, %v678_v59, 0.0 }
 0x255   : > { %v670_v25 = vpop.permute.xlu1 %669  ;;  %v692_v29 = vadd.f32 %v691_v9, %v690_v24 }
 0x256   : > { %v679_v28 = vmul.f32 %v670_v25, %v572_v31 }
 0x258   : > { %v693_v26 = vsel %vm574_vm11, %v679_v28, 0.0 }
 0x259   : > { %v694_v5 = vadd.f32 %v693_v26, %v692_v29 }
 0x25b   : > { %v695_v27 = vrot.slane %v694_v5, 4 }
 0x25d   : > { %v696_v21 = vadd.f32 %v695_v27, %v694_v5 }
 0x25f   : > { %v697_v30 = vrot.slane %v696_v21, 2 }
 0x261   : > { %v698_v12 = vadd.f32 %v697_v30, %v696_v21 }
 0x263   : > { %v699_v10 = vrot.slane %v698_v12, 1 }
 0x265   : > { %v700_v33 = vadd.f32 %v699_v10, %v698_v12  ;;  %706 = sbr.rel (%p818_p5) target bundleno = 784 (0x310), region = 36 }
 0x267   : > { %v701_v34 = vadd.f32 %v700_v33, %v631_v13 }
 0x269   : > { %702 = vst.msk [vmem:[#allocation4] sm:$0x1] %vm597_vm12, %v701_v34 }
 0x26a   : > { %v707_v19 = vld [vmem:[#allocation2] sm:$0x1]  ;;  %v710_v38 = vld [vmem:[#allocation3] sm:$0x1]  ;;  %vm724_vm11 = vcmask 0  }
 0x26b   : > { %vm708_vm14 = vcmp.gt.f32.partialorder %v707_v19, 0.0  ;;  %v718_v35 = vmul.f32 0.005, %v707_v19 }
 0x26c   : > { %v709_v31 = vsel %vm708_vm14, %v707_v19, 1.0 }
 0x26d   : > { %880 = vrcp.f32 %v709_v31 }
 0x270   : > { %v713_v32 = vld [vmem:[#allocation4] sm:$0x1] }
 0x27a   : > { %v881_v39 = vpop.eup %880 }
 0x27b   : > { %v712_v14 = vmul.f32 %v881_v39, %v710_v38  ;;  %v714_v40 = vmul.f32 %v881_v39, %v713_v32 }
 0x27d   : > { %v715_v41 = vsub.f32 %v712_v14, %v714_v40 }
 0x27f   : > { %v716_v42 = vand.u32 2147483647, %v715_v41 }
 0x281   : > { %v719_v44 = vmul.f32 %v718_v35, %v716_v42 }
 0x283   : > { %v720_v20 = vsel %vm708_vm14, %v719_v44, 0.0 }
 0x284   : > { %v721_v45 = vsel %vm597_vm12, %v720_v20, 0.0 }
 0x285   : > { %722 = vadd.xlane.f32.xlu0 %v721_v45 }
 0x30e   : > { %v723_v46 = vpop.xlane.xlu0 %722 }
 0x30f   : > { %725 = vst.msk [vmem:[#allocation5] sm:$0x1] %vm724_vm11, %v723_v46 }
 0x310 PF: > { %p827_p6 = scmp.eq.s32.totalorder %s943_s10, 3  ;;  %s921_s20 = smov [#allocation5]  }
 0x311   : > { %s733_s21 = sshll.u32 %s921_s20, 4  ;;  %s734_s21 = int_to_ptr.vmem [resolvable:$true] %s733_s21 }
 0x312   : > { %s882_s22 = scalar_lea.vmem %s734_s21, 16  ;;  %s888_s23 = scalar_lea.vmem %s734_s21, 32 }
 0x313   : > { %p883_p7 = scmp.ne.s32.totalorder %s734_s21, %s882_s22  ;;  %p889_p10 = scmp.lt.s32.totalorder %s734_s21, %s734_s21 }
 0x314   : > { %p890_p11 = scmp.lt.s32.totalorder %s888_s23, %s882_s22 }
 0x315   : > { %p884_p8 = pnand %p883_p7, %p827_p6 }
 0x316   : > { %p891_p12 = por %p890_p11, %p889_p10 }
 0x317   : > { %p885_p9 = pneg %p884_p8 }
 0x319   : > { %p892_p13 = pnand %p891_p12, %p885_p9 }
 0x31b   : > { %895 = shalt.err (!%p892_p13)
}
 0x31c   : > { %824 = dma.vmem_to_hbm [thread:$0]  (%p827_p6), %s734_s21, 16, %s1285_s2, [#allocation6]  }
 0x31d   : > { %911 = dma.done.wait (%p827_p6), [#allocation6], 16  }
 0x31e   : > { %913 = vsyncadd (%p827_p6), [#allocation6], 4294967280 }
 0x31f PF: > { %s13_s9 = sadd.s32 1, %s916_s9  }
 0x320   : > { %p10_p0 = scmp.ge.s32.totalorder %s13_s9, 6  }
 0x322   :  { %12 = sbr.rel (!%p10_p0) target bundleno = 1 (0x1), region = 66 }
 0x327   :  { %746 = vsyncpa [#allocation6], 1 }
 0x328   :  { %748 = vsyncpa [#allocation6 + $0x1], 1 }

</bundles_post_ra>
